<compile_context>
chip_gen: v7x
topology: tpu7x:2x2x1
jax: 0.10.0
libtpu: 0.0.40
codegen_flags: <defaults>
</compile_context>

<pallas_src>
import functools
import math

import jax
import jax.numpy as jnp
from jax.experimental import pallas as pl
from jax.experimental.pallas import tpu as pltpu


def _round_up(x, m):
    return ((x + m - 1) // m) * m


def _vmem_capacity_bytes():
    # Generation-aware VMEM ceiling (v7x: 64 MiB physical; v5e/v6e: 128 MiB).
    try:
        return int(getattr(pltpu.get_tpu_info(), "vmem_capacity_bytes", 64 << 20))
    except Exception:
        return 64 << 20


def _orf_kernel(x_ref, w_ref, b_ref, o_ref, *, scale):
    # x_ref: (tm, in_p)   w_ref: (in_p, feat_p)   b_ref: (1, feat_p)   o_ref: (tm, feat_p)
    proj = jnp.dot(x_ref[...], w_ref[...], preferred_element_type=jnp.float32)
    proj = proj + b_ref[...]  # f32 phase bias broadcast over rows
    # sin is folded into a phase-shifted cos via the bias: one transcendental
    # pass over a lane-dense tile and one contiguous (unmasked) store.
    # TODO(synk): on v7x with bf16 outputs, evaluate the cos epilogue in bf16 if
    # a bundle dump shows the VPU (not HBM) is the binding unit.
    o_ref[...] = (jnp.cos(proj) * scale).astype(o_ref.dtype)


def prepare_orf_params(W, b, compute_dtype=None):
    """One-time (init-time) parameter layout for the fused ORF kernel.

    Returns (W_bd, b_bd, pack, feature_dim).  Hoist this out of the hot path
    (analogue of registering the W/b buffers in the PyTorch module).
    """
    in_dim, num_proj = W.shape
    feature_dim = 2 * num_proj
    if compute_dtype is None:
        compute_dtype = W.dtype
    itemsize = jnp.dtype(compute_dtype).itemsize

    # Fold sin into a phase-shifted cos:  [cos(t), sin(t)] == cos([t, t - pi/2]).
    W2 = jnp.concatenate([W, W], axis=1)                    # (in_dim, feature_dim)
    b2 = jnp.concatenate([b, b - (math.pi / 2.0)], axis=0)  # (feature_dim,)

    pack = 128 // math.gcd(feature_dim, 128)
    w_bd_bytes = (pack * in_dim) * (pack * feature_dim) * itemsize
    if pack > 8 or (pack > 1 and w_bd_bytes > (4 << 20)):
        # Column-pad fallback: keep output stores lane-dense (unmasked vst)
        # without the pack^2 W growth / pack x MXU inflation.
        pack = 1
        feat_p = _round_up(feature_dim, 128)
        if feat_p != feature_dim:
            W2 = jnp.pad(W2, ((0, 0), (0, feat_p - feature_dim)))
            b2 = jnp.pad(b2, (0, feat_p - feature_dim))
    elif pack > 1:
        # Block-diagonal projection keeps packed rows independent: packed slot p
        # only reads its own x row and writes its own output slot.
        eye = jnp.eye(pack, dtype=W2.dtype)
        W2 = jnp.einsum("pq,kf->pkqf", eye, W2).reshape(pack * in_dim,
                                                        pack * feature_dim)
        b2 = jnp.tile(b2, pack)
        feat_p = pack * feature_dim
    else:
        feat_p = feature_dim

    W_bd = W2.astype(compute_dtype)
    # Keep the phase bias in f32 (tiny array; preserves the -pi/2 shift exactly
    # and adds directly into the f32 MXU accumulator).
    b_bd = b2.reshape(1, feat_p).astype(jnp.float32)
    return W_bd, b_bd, pack, feature_dim


@functools.partial(jax.jit, static_argnames=("pack", "feature_dim"))
def orf_forward(x, W_bd, b_bd, *, pack, feature_dim):
    """ORF forward with prepared params.  x: (..., in_dim) -> (..., feature_dim)."""
    if x.dtype != W_bd.dtype:
        x = x.astype(W_bd.dtype)

    in_p, feat_p = W_bd.shape
    in_dim = in_p // pack
    num_proj = feature_dim // 2
    scale = math.sqrt(1.0 / num_proj)

    lead_shape = x.shape[:-1]
    M = math.prod(lead_shape) if lead_shape else 1
    x2 = x.reshape(M, in_dim)

    # Pad rows only up to a multiple of `pack` (< pack extra rows).  The last
    # row tile of the grid is left ragged instead of padding to a tile multiple,
    # so there is no extra full HBM pass over x or over the output.
    phys_rows = -(-M // pack)
    M_pack = phys_rows * pack
    if M_pack != M:
        x2 = jnp.pad(x2, ((0, M_pack - M), (0, 0)))
    x_packed = x2.reshape(phys_rows, in_p)

    itemsize = jnp.dtype(x_packed.dtype).itemsize
    sub = 8 * (4 // max(1, itemsize))            # sublane multiple: 8 f32 / 16 bf16

    # Row tile: ~3 MiB of x+out traffic per grid step (amortizes the ~0.35us
    # fixed per-step cost), capped so double-buffered x+out tiles fit a ~16 MiB
    # VMEM budget.  No forced multi-step split on single-TC chips.
    bytes_per_row = (in_p + feat_p) * itemsize
    tile_budget = 16 << 20
    target_step_bytes = 3 << 20
    tm_cap = max(sub, (tile_budget // (2 * bytes_per_row)) // sub * sub)
    tm = max(sub, min(tm_cap,
                      _round_up(max(1, target_step_bytes // bytes_per_row), sub)))
    if phys_rows <= tm:
        tm = _round_up(phys_rows, sub)           # tiny input: one ragged tile
    else:
        g = pl.cdiv(phys_rows, tm)
        if g % 2:                                # balance v7x's 2 TensorCores
            tm = max(sub, _round_up(pl.cdiv(phys_rows, g + 1), sub))
    grid = pl.cdiv(phys_rows, tm)

    w_itemsize = jnp.dtype(W_bd.dtype).itemsize
    cost = pl.CostEstimate(
        flops=2 * grid * tm * in_p * feat_p,     # actual MXU work incl. pack/pad
        transcendentals=grid * tm * feat_p,
        bytes_accessed=phys_rows * (in_p + feat_p) * itemsize
        + W_bd.size * w_itemsize + b_bd.size * 4,
    )

    # Double-buffered x/out tiles + (double-buffered) resident W/b, 2x headroom,
    # generation-aware ceiling (~48 MiB on v7x, ~96 MiB on v5e/v6e).
    vmem_need = (
        2 * itemsize * tm * (in_p + feat_p)
        + 2 * w_itemsize * in_p * feat_p
        + 2 * 4 * feat_p
    )
    vmem_limit = int(min(int(0.75 * _vmem_capacity_bytes()),
                         max(4 << 20, 2 * vmem_need)))

    out = pl.pallas_call(
        functools.partial(_orf_kernel, scale=scale),
        out_shape=jax.ShapeDtypeStruct((phys_rows, feat_p), x_packed.dtype),
        grid_spec=pltpu.PrefetchScalarGridSpec(
            num_scalar_prefetch=0,
            grid=(grid,),
            in_specs=[
                pl.BlockSpec((tm, in_p), lambda i: (i, 0)),
                # TODO(synk): if W_bd ever grows large, stage it once (single
                # buffering) instead of the default double-buffered residency.
                pl.BlockSpec((in_p, feat_p), lambda i: (0, 0)),
                pl.BlockSpec((1, feat_p), lambda i: (0, 0)),
            ],
            out_specs=pl.BlockSpec((tm, feat_p), lambda i: (i, 0)),
        ),
        compiler_params=pltpu.CompilerParams(
            dimension_semantics=("parallel",),
            vmem_limit_bytes=vmem_limit,
        ),
        cost_estimate=cost,
    )(x_packed, W_bd, b_bd)

    # Undo packing / padding (no-ops when M is already a pack multiple and the
    # feature axis was not column-padded).
    if pack > 1:
        out = out.reshape(M_pack, feature_dim)
        if M_pack != M:
            out = out[:M]
    elif feat_p != feature_dim:
        out = out[:, :feature_dim]
    return out.reshape(*lead_shape, feature_dim)


def orthogonal_random_features(x, W, b):
    """Drop-in equivalent of the PyTorch forward (prepares params every call;
    prefer prepare_orf_params(...) once + orf_forward(...) in a hot loop)."""
    W_bd, b_bd, pack, feature_dim = prepare_orf_params(W, b, compute_dtype=W.dtype)
    return orf_forward(x, W_bd, b_bd, pack=pack, feature_dim=feature_dim)


def reference_orf(x, W, b):
    num_proj = W.shape[1]
    proj = jnp.matmul(x, W) + b
    phi = jnp.concatenate([jnp.cos(proj), jnp.sin(proj)], axis=-1)
    return phi * math.sqrt(1.0 / num_proj)


if __name__ == "__main__":
    # Module config: in_dim=32, feature_dim=64 (even), gamma=1.0, learnable=False
    in_dim = 32
    feature_dim = 64
    gamma = 1.0
    num_proj = feature_dim // 2

    key = jax.random.PRNGKey(0)
    k_x, k_w, k_b = jax.random.split(key, 3)

    # Parameter init mirrors __init__: W = QR-orthogonalized Gaussian * gamma,
    # b ~ U(0, 2*pi).  (Init happens outside the kernel, as in the module.)
    matrix_dim = max(in_dim, num_proj)
    gaussian = jax.random.normal(k_w, (matrix_dim, matrix_dim), dtype=jnp.float32)
    q, _ = jnp.linalg.qr(gaussian)
    W = q[:in_dim, :num_proj] * gamma
    b = jax.random.uniform(k_b, (num_proj,), dtype=jnp.float32) * (2.0 * math.pi)

    # Input: (batch=2, seq=8, in_dim=32)
    x = jax.random.normal(k_x, (2, 8, in_dim), dtype=jnp.float32)

    # Hoisted usage: prepare once (init time), run the jitted fused forward.
    W_bd, b_bd, pack, fdim = prepare_orf_params(W, b)
    out = jax.block_until_ready(
        orf_forward(x, W_bd, b_bd, pack=pack, feature_dim=fdim))

    ref = reference_orf(x, W, b)
    assert out.shape == (2, 8, feature_dim), out.shape
    max_err = float(jnp.max(jnp.abs(out - ref)))
    assert max_err < 1e-4, max_err

    print("KERNEL_OK")
</pallas_src>

<mosaic_0001>
module attributes {stable_mosaic.version = 11 : i64} {
  func.func @_orf_kernel(%arg0: i32, %arg1: memref<8x64xf32, #tpu.memory_space<vmem>>, %arg2: memref<64x128xf32, #tpu.memory_space<vmem>>, %arg3: memref<1x128xf32, #tpu.memory_space<vmem>>, %arg4: memref<8x128xf32, #tpu.memory_space<vmem>>) attributes {dimension_semantics = [#tpu.dimension_semantics<parallel>], iteration_bounds = array<i64: 1>, scalar_prefetch = 0 : i64, scratch_operands = 0 : i64, tpu.core_type = #tpu.core_type<tc>, window_params = [{transform_indices = @transform_0, window_bounds = array<i64: 8, 64>}, {pipeline_mode = #tpu.pipeline_mode<synchronous>, transform_indices = @transform_1, window_bounds = array<i64: 64, 128>}, {pipeline_mode = #tpu.pipeline_mode<synchronous>, transform_indices = @transform_2, window_bounds = array<i64: 1, 128>}, {transform_indices = @transform_3, window_bounds = array<i64: 8, 128>}]} {
    %c0 = arith.constant 0 : index
    %c0_0 = arith.constant 0 : index
    %0 = vector.load %arg1[%c0, %c0_0] : memref<8x64xf32, #tpu.memory_space<vmem>>, vector<8x64xf32>
    %c0_1 = arith.constant 0 : index
    %c0_2 = arith.constant 0 : index
    %1 = vector.load %arg2[%c0_1, %c0_2] : memref<64x128xf32, #tpu.memory_space<vmem>>, vector<64x128xf32>
    %cst = arith.constant dense<0.000000e+00> : vector<8x128xf32>
    %2 = tpu.matmul %0, %1, %cst {dimension_numbers = #tpu.dot_dimension_numbers<[1], [0], [0], [1], [0, 0, 1, 1], [], []>} : vector<8x64xf32>, vector<64x128xf32>, vector<8x128xf32> -> vector<8x128xf32>
    %c0_3 = arith.constant 0 : index
    %c0_4 = arith.constant 0 : index
    %3 = vector.load %arg3[%c0_3, %c0_4] : memref<1x128xf32, #tpu.memory_space<vmem>>, vector<1x128xf32>
    %4 = vector.broadcast %3 : vector<1x128xf32> to vector<8x128xf32>
    %5 = arith.addf %2, %4 : vector<8x128xf32>
    %6 = math.cos %5 : vector<8x128xf32>
    %cst_5 = arith.constant 0.176776692 : f32
    %7 = vector.broadcast %cst_5 : f32 to vector<8x128xf32>
    %8 = arith.mulf %6, %7 : vector<8x128xf32>
    %c0_6 = arith.constant 0 : index
    %c0_7 = arith.constant 0 : index
    %9 = vector.load %arg4[%c0_6, %c0_7] : memref<8x128xf32, #tpu.memory_space<vmem>>, vector<8x128xf32>
    tpu.vector_store %arg4[%c0_6, %c0_7], %8 {strides = array<i32>} : memref<8x128xf32, #tpu.memory_space<vmem>>, vector<8x128xf32>,
    return
  }
  func.func @transform_0(%arg0: i32) -> (i32, i32) {
    %c0_i32 = arith.constant 0 : i32
    %c0_i32_0 = arith.constant 0 : i32
    return %arg0, %c0_i32 : i32, i32
  }
  func.func @transform_1(%arg0: i32) -> (i32, i32) {
    %c0_i32 = arith.constant 0 : i32
    %c0_i32_0 = arith.constant 0 : i32
    %c0_i32_1 = arith.constant 0 : i32
    return %c0_i32, %c0_i32_0 : i32, i32
  }
  func.func @transform_2(%arg0: i32) -> (i32, i32) {
    %c0_i32 = arith.constant 0 : i32
    %c0_i32_0 = arith.constant 0 : i32
    %c0_i32_1 = arith.constant 0 : i32
    return %c0_i32, %c0_i32_0 : i32, i32
  }
  func.func @transform_3(%arg0: i32) -> (i32, i32) {
    %c0_i32 = arith.constant 0 : i32
    %c0_i32_0 = arith.constant 0 : i32
    return %arg0, %c0_i32 : i32, i32
  }
}

</mosaic_0001>

<bundles_post_ra>
// kernel: orf_forward.1
= control target key start
LH: loop header
LB: loop body
LE: loop exit
PB: predicated region body
PF: predicated region fallthrough
CT: control target
= control target key end

     0   :  { %8 = vsyncpa [#allocation3], 0  ;;  %s318_s12 = smov [#allocation2]   ;;  %s392_s0 = inlined_call_operand.vmem [shape: f32[8,64], index: 0, kind: input, shape index: {}]   ;;  %s393_s1 = inlined_call_operand.hbm [shape: f32[64,128], index: 1, kind: input, shape index: {}]   ;;  %s394_s2 = inlined_call_operand.vmem [shape: f32[1,128], index: 2, kind: input, shape index: {}]   ;;  %s395_s3 = inlined_call_operand.vmem [shape: f32[8,128], index: 3, kind: output, shape index: {}]  }
   0x1   :  { %s16_s13 = sshll.u32 %s318_s12, 4  ;;  %s294_s16 = scalar_lea.hbm %s393_s1, 1024  ;;  %s17_s13 = int_to_ptr.vmem [resolvable:$true] %s16_s13 }
   0x2   :  { %p295_p0 = scmp.ne.s32.totalorder %s393_s1, %s294_s16  ;;  %p298_p1 = scmp.lt.u32.totalorder %s294_s16, %s393_s1 }
   0x4   :  { %p300_p2 = pnand %p298_p1, %p295_p0 }
   0x6   :  { %303 = shalt.err (!%p300_p2)
}
   0x7   :  { %s304_s21 = scalar_lea.vmem %s17_s13, 1024  ;;  %p309_p4 = scmp.lt.s32.totalorder %s17_s13, %s17_s13 }
   0x8   :  { %p305_p3 = scmp.ne.s32.totalorder %s17_s13, %s304_s21  ;;  %p310_p5 = scmp.lt.s32.totalorder %s304_s21, %s304_s21 }
   0xa   :  { %p311_p6 = por %p310_p5, %p309_p4 }
   0xc   :  { %p312_p7 = pnand %p311_p6, %p305_p3 }
   0xe   :  { %315 = shalt.err (!%p312_p7)
}
   0xf   :  { %s319_s22 = smov 128   ;;  %s320_s23 = smov 8  }
  0x10   :  { %22 = dma.hbm_to_vmem [thread:$0]  %s393_s1, 1024, %s17_s13, [#allocation3], %s319_s22, %s319_s22, %s320_s23  }
  0x11   :  { %316 = dma.done.wait [#allocation3], 1024  }
  0x12   :  { %317 = vsyncadd [#allocation3], 4294966272  ;;  %v321_v0 = vmov 0.0|0.0   ;;  %vm322_vm0 = vmmov 0   ;;  %v323_v1 = vmov 0.0   ;;  %v29_v2 = vld [vmem:[#allocation2] sm:$0xff] }
  0x13   :  { %262 = vmatprep.subr.bf16.mxu0 %v321_v0  ;;  %259 = vmatprep.mubr.msk.f32.mxu0 %vm322_vm0, %v323_v1  ;;  %v30_v3 = vld [vmem:[#allocation2 + $0x8] sm:$0xff]  ;;  %v31_v4 = vld [vmem:[#allocation2 + $0x10] sm:$0xff]  ;;  %v32_v6 = vld [vmem:[#allocation2 + $0x18] sm:$0xff]  ;;  %vm44_vm1 = vcmask 523264   ;;  %v324_v29 = vmov 683565275  }
  0x14   :  { %v263_v5 = vpack.c.bf16 %v30_v3, %v29_v2  ;;  %v266_v7 = vpack.c.bf16 %v32_v6, %v31_v4  ;;  %v33_v8 = vld [vmem:[#allocation2 + $0x20] sm:$0xff]  ;;  %v34_v9 = vld [vmem:[#allocation2 + $0x28] sm:$0xff]  ;;  %v35_v11 = vld [vmem:[#allocation2 + $0x30] sm:$0xff]  ;;  %v325_v31 = vmov 2475754826  }
  0x15   :  { %v269_v10 = vpack.c.bf16 %v34_v9, %v33_v8  ;;  %v36_v12 = vld [vmem:[#allocation2 + $0x38] sm:$0xff]  ;;  %v28_v14 = vld [vmem:[%s392_s0] sm:$0xff]  ;;  %v326_v34 = vmov 2131351028   ;;  %v327_v37 = vmov 2102212464  }
  0x16   :  { %264 = vmatpush3.bf16.msra.mxu0 %v263_v5  ;;  %v272_v13 = vpack.c.bf16 %v36_v12, %v35_v11  ;;  %v228_v15 = vld [vmem:[%s394_s2] ss:$0 sm:$0xff]  ;;  %v328_v40 = vmov 920167782   ;;  %v329_v43 = vmov 1326507024  }
  0x17   :  { %265 = vmatprep.subr.bf16.mxu0 %v321_v0 }
  0x1a   :  { %267 = vmatpush3.bf16.msra.mxu0 %v266_v7 }
  0x1b   :  { %268 = vmatprep.subr.bf16.mxu0 %v321_v0 }
  0x1e   :  { %270 = vmatpush3.bf16.msra.mxu0 %v269_v10 }
  0x1f   :  { %271 = vmatprep.subr.bf16.mxu0 %v321_v0 }
  0x22   :  { %273 = vmatpush3.bf16.msra.mxu0 %v272_v13 }
  0x25   :  { %260 = vmatmul.mubr.msk.f32.vlgmr.msra.gmra.mrb[0].mxu0 %vm44_vm1, %v28_v14 }
  0xf8   :  { %v114_v16 = vpop.f32.mrb[0].mxu0 }
  0xf9   :  { %v368_v17 = vadd.f32 %v228_v15, %v114_v16  ;;  %v261_v18 = vpop.f32.mrb[1].mxu0 }
  0xfb   :  { %v121_v19 = vand.u32 2139095040, %v368_v17  ;;  %v118_v23 = vand.u32 2147483647, %v368_v17  ;;  %vm120_vm9 = vcmp.lt.s32.totalorder %v368_v17, 0  ;;  %vm210_vm14 = vweird.f32 %v368_v17 }
  0xfd   :  { %v122_v20 = vshrl.u32 %v121_v19, 23  ;;  %v125_v26 = vand.u32 8388607, %v118_v23  ;;  %vm119_vm10 = vcmp.le.f32.partialorder %v118_v23, 0.7853982 }
  0xff   :  { %v230_v21 = vadd.s32 4294967169, %v122_v20  ;;  %v126_v45 = vor.u32 8388608, %v125_v26 }
 0x101   :  { %v128_v22 = vadd.s32 1, %v230_v21  ;;  %v166_v59 = vshll.u32 %v126_v45, 8 }
 0x103   :  { %vm129_vm2 = vcmp.gt.s32.totalorder %v128_v22, 0 }
 0x104   :  { %v130_v24 = vsel %vm129_vm2, %v128_v22, 0 }
 0x105   :  { %v132_v25 = vand.u32 31, %v130_v24  ;;  %v131_v28 = vshrl.u32 %v130_v24, 5 }
 0x107   :  { %v133_v27 = vsub.s32 32, %v132_v25  ;;  %v135_v30 = vshll.u32 %v324_v29, %v132_v25  ;;  %v138_v32 = vshll.u32 %v325_v31, %v132_v25  ;;  %v141_v36 = vshll.u32 %v326_v34, %v132_v25 }
 0x108   :  { %v144_v39 = vshll.u32 %v327_v37, %v132_v25  ;;  %v147_v42 = vshll.u32 %v328_v40, %v132_v25  ;;  %vm150_vm3 = vcmp.lt.s32.totalorder %v131_v28, 1  ;;  %vm153_vm4 = vcmp.lt.s32.totalorder %v131_v28, 4 }
 0x109   :  { %v136_v33 = vshrl.u32 %v325_v31, %v133_v27  ;;  %v139_v35 = vshrl.u32 %v326_v34, %v133_v27  ;;  %v142_v38 = vshrl.u32 %v327_v37, %v133_v27  ;;  %v145_v41 = vshrl.u32 %v328_v40, %v133_v27 }
 0x10a   :  { %v148_v44 = vshrl.u32 %v329_v43, %v133_v27  ;;  %v134_v54 = vshrl.u32 %v324_v29, %v133_v27  ;;  %vm152_vm5 = vcmp.lt.s32.totalorder %v131_v28, 3  ;;  %vm151_vm6 = vcmp.lt.s32.totalorder %v131_v28, 2 }
 0x10b   :  { %v137_v46 = vor.u32 %v136_v33, %v135_v30  ;;  %v140_v47 = vor.u32 %v139_v35, %v138_v32  ;;  %v143_v48 = vor.u32 %v142_v38, %v141_v36  ;;  %v146_v49 = vor.u32 %v145_v41, %v144_v39 }
 0x10c   :  { %v149_v50 = vor.u32 %v148_v44, %v147_v42 }
 0x10d   :  { %v155_v51 = vsel %vm153_vm4, %v143_v48, 2102212464  ;;  %v158_v52 = vsel %vm150_vm3, %v137_v46, %v140_v47  ;;  %v162_v53 = vsel %vm150_vm3, %v140_v47, %v143_v48  ;;  %v159_v55 = vsel %vm153_vm4, %v146_v49, 920167782 }
 0x10e   :  { %v163_v56 = vsel %vm153_vm4, %v149_v50, 1326507024  ;;  %v160_v57 = vsel %vm152_vm5, %v143_v48, %v159_v55  ;;  %v154_v60 = vsel %vm150_vm3, %v134_v54, %v137_v46  ;;  %v156_v61 = vsel %vm152_vm5, %v140_v47, %v155_v51 }
 0x10f   :  { %v164_v58 = vsel %vm152_vm5, %v146_v49, %v163_v56  ;;  %v161_v62 = vsel %vm151_vm6, %v158_v52, %v160_v57  ;;  %v157_v4 = vsel %vm151_vm6, %v154_v60, %v156_v61 }
 0x110   :  { %v165_v63 = vsel %vm151_vm6, %v162_v53, %v164_v58  ;;  %v377_v2 = vmul.u32.u64.low %v166_v59, %v161_v62  ;;  %v378_v3 = vmul.u32.u64.high %v166_v59, %v161_v62, %v377_v2  ;;  %v173_v6 = vmul.u32 %v166_v59, %v157_v4 }
 0x111   :  { %v374_v0 = vmul.u32.u64.low %v166_v59, %v165_v63  ;;  %v375_v1 = vmul.u32.u64.high %v166_v59, %v165_v63, %v374_v0 }
 0x112   :  { %v176_v5 = vadd.s32 1, %v378_v3 }
 0x113   :  { %vm175_vm7 = vc.u32 %v375_v1, %v377_v2  ;;  %v174_v19 = vadd.s32 %v377_v2, %v375_v1 }
 0x114   :  { %v177_v7 = vsel %vm175_vm7, %v176_v5, %v378_v3 }
 0x115   :  { %v178_v8 = vadd.s32 %v177_v7, %v173_v6 }
 0x117   :  { %v179_v9 = vadd.s32 536870912, %v178_v8 }
 0x119   :  { %v180_v10 = vshrl.u32 %v179_v9, 30 }
 0x11b   :  { %v181_v11 = vshll.u32 %v180_v10, 30  ;;  %v204_v34 = vsub.s32 4, %v180_v10 }
 0x11d   :  { %v182_v12 = vsub.s32 %v178_v8, %v181_v11  ;;  %v205_v36 = vsel %vm120_vm9, %v204_v34, %v180_v10 }
 0x11e   :  { %v207_v37 = vsel %vm119_vm10, 0, %v205_v36 }
 0x11f   :  { %v184_v13 = vsub.s32 0, %v182_v12  ;;  %v211_v38 = vand.u32 3, %v207_v37 }
 0x121   :  { %v231_v14 = vmin.u32 %v184_v13, %v182_v12  ;;  %vm216_vm11 = vcmp.eq.s32.totalorder %v211_v38, 2  ;;  %vm213_vm12 = vcmp.eq.s32.totalorder %v211_v38, 0  ;;  %vm212_vm13 = vcmp.lt.s32.totalorder %v211_v38, 2 }
 0x123   :  { %v186_v15 = vclz %v231_v14 }
 0x125   :  { %v232_v16 = vadd.s32 4294967294, %v186_v15 }
 0x127   :  { %vm233_vm8 = vcmp.lt.s32.totalorder %v232_v16, 0 }
 0x128   :  { %v189_v18 = vsel %vm233_vm8, 0, %v232_v16 }
 0x129   :  { %v190_v20 = vsub.s32 32, %v189_v18  ;;  %v194_v21 = vsub.s32 4294967266, %v189_v18  ;;  %v191_v22 = vshll.u32 %v182_v12, %v189_v18 }
 0x12b   :  { %v192_v24 = vshrl.u32 %v174_v19, %v190_v20  ;;  %v195_v25 = vadd.s32 127, %v194_v21 }
 0x12d   :  { %v193_v26 = vor.u32 %v192_v24, %v191_v22  ;;  %v196_v27 = vshll.u32 %v195_v25, 23 }
 0x12f   :  { %v197_v28 = vor.u32 4788187, %v196_v27  ;;  %v200_v30 = vcvt.s32.f32 %v193_v26 }
 0x131   :  { %v198_v29 = vand.u32 2147483647, %v197_v28 }
 0x133   :  { %v201_v31 = vmul.f32 %v200_v30, %v198_v29 }
 0x135   :  { %v202_v32 = vxor.u32 2147483648, %v201_v31 }
 0x137   :  { %v203_v33 = vsel %vm120_vm9, %v202_v32, %v201_v31 }
 0x138   :  { %v206_v35 = vsel %vm119_vm10, %v368_v17, %v203_v33 }
 0x139   :  { %290 = vcosq.f32 %v206_v35 }
 0x13a   :  { %292 = vsinq.f32 %v206_v35 }
 0x143   :  { %v291_v39 = vpop.eup %290 }
 0x144   :  { %v293_v40 = vpop.eup %292  ;;  %v217_v41 = vxor.u32 2147483648, %v291_v39 }
 0x145   :  { %v214_v42 = vxor.u32 2147483648, %v293_v40 }
 0x146   :  { %v218_v43 = vsel %vm216_vm11, %v217_v41, %v293_v40 }
 0x147   :  { %v215_v44 = vsel %vm213_vm12, %v291_v39, %v214_v42 }
 0x148   :  { %v219_v23 = vsel %vm212_vm13, %v215_v44, %v218_v43 }
 0x149   :  { %v220_v45 = vsel %vm210_vm14, nan, %v219_v23 }
 0x14a   :  { %v221_v46 = vmul.f32 0.17677669, %v220_v45 }
 0x14c   :  { %222 = vst [vmem:[%s395_s3] sm:$0xff] %v221_v46 }
 0x14d   :  { %227 = vsyncpa [#allocation3], 1 }

</bundles_post_ra>
